<compile_context>
chip_gen: v6e
topology: v6e:2x2x1
jax: 0.10.0
libtpu: 0.0.40
codegen_flags: <defaults>
</compile_context>

<pallas_src>
import functools

import jax
import jax.numpy as jnp
from jax.experimental import pallas as pl
from jax.experimental.pallas import tpu as pltpu


def _round_up(x, m):
    return ((x + m - 1) // m) * m


def _pixadv_kernel(logits_ref, labels_ref, disc_ref, wpc_ref, out_ref, *,
                   ignore_index, target_val, exp_dtype):
    # Blocks:
    #   logits_ref: (1, C, TP)        labels_ref: (1, 1, TP) int32
    #   disc_ref:   (1, 1, TP)        wpc_ref:    (1, C, 1)  f32
    #   out_ref:    (1, 1, 8, 128) f32 (one partial sum per grid step)
    logits = logits_ref[0].astype(jnp.float32)   # (C, TP)
    labels = labels_ref[0]                       # (1, TP) int32
    disc = disc_ref[0].astype(jnp.float32)       # (1, TP)
    wpc = wpc_ref[0].astype(jnp.float32)         # (C, 1)

    # --- BCE with logits against constant target z (0 for 'source', 1 for 'target')
    z = jnp.float32(target_val)
    bce = jnp.maximum(disc, 0.0) - disc * z + jnp.log1p(jnp.exp(-jnp.abs(disc)))

    # --- per-pixel cross entropy with ignore_index
    m = jnp.max(logits, axis=0, keepdims=True)                              # (1, TP)
    shifted = logits - m                                                    # (C, TP)
    if jnp.dtype(exp_dtype) != jnp.dtype(jnp.float32):
        e = jnp.exp(shifted.astype(exp_dtype)).astype(jnp.float32)
    else:
        e = jnp.exp(shifted)
    lse = m + jnp.log(jnp.sum(e, axis=0, keepdims=True))                    # (1, TP)

    cls_iota = jax.lax.broadcasted_iota(jnp.int32, logits.shape, 0)         # (C, TP)
    mask = cls_iota == labels                                               # (C, TP) bool
    picked = jnp.sum(jnp.where(mask, logits, 0.0), axis=0, keepdims=True)   # (1, TP)
    valid = labels != ignore_index
    ce = jnp.where(valid, lse - picked, 0.0)                                # (1, TP)
    # Note: labels >= C that are != ignore_index give ce = lse (nothing
    # picked); the PyTorch reference would error on such labels.

    # --- per-pixel class-balance weight: gather of precomputed per-class
    # weights.  Pixels with label == ignore_index (incl. padding) get weight 0
    # here; their ce is 0, so the product matches the reference exactly.
    weight = jnp.sum(jnp.where(mask, wpc, 0.0), axis=0, keepdims=True)      # (1, TP)

    tile_sum = jnp.sum(bce * ce * weight)

    # Write the scalar partial sum into element [0,0,0,0] of this grid step's
    # private output block; everything else is 0, so the XLA-side jnp.sum of
    # the whole output recovers the exact total.
    row = jax.lax.broadcasted_iota(jnp.int32, out_ref.shape, 2)
    col = jax.lax.broadcasted_iota(jnp.int32, out_ref.shape, 3)
    out_ref[...] = jnp.where((row == 0) & (col == 0), tile_sum, 0.0)


def pix_adv_loss(parser_prediction, discriminator_pred, labels, fool='source',
                 ignore_index=255, size_average=True, pixels_per_tile=8192,
                 exp_dtype=jnp.float32):
    """parser_prediction: (N, C, H, W) logits (f32 or bf16, NCHW like PyTorch)
       discriminator_pred: (N, 1, H, W) logits
       labels: (N, H, W) int labels in [0, C-1] or == ignore_index
    """
    N, C, H, W = parser_prediction.shape
    P = H * W

    # Flatten pixels along the lane dimension.  Keep the input dtype (no HBM
    # f32 upcast in the wrapper); the kernel casts after the VMEM load.
    logits = parser_prediction.reshape(N, C, P)
    disc = discriminator_pred.reshape(N, 1, P)
    labs = labels.reshape(N, 1, P).astype(jnp.int32)

    # Per-sample, per-class pixel counts -> per-class balance weights.
    # ignore_index pixels never match a class in [0, C), matching the
    # reference (their weight is irrelevant since their ce is 0).
    cls = jnp.arange(C, dtype=jnp.int32)
    counts = jnp.sum(labs[:, 0, :, None] == cls[None, None, :], axis=1)     # (N, C)
    wpc = (1.0 - counts.astype(jnp.float32) * jnp.float32(1.0 / P))         # (N, C)
    wpc = wpc.reshape(N, C, 1)

    # Tile the pixel dimension; pad so P_pad % TP == 0.  Padded pixels get
    # ignore_index labels -> zero contribution to the loss.
    TP = min(int(pixels_per_tile), _round_up(P, 128))
    P_pad = _round_up(P, TP)
    if P_pad != P:
        pad = P_pad - P
        logits = jnp.pad(logits, ((0, 0), (0, 0), (0, pad)))
        disc = jnp.pad(disc, ((0, 0), (0, 0), (0, pad)))
        labs = jnp.pad(labs, ((0, 0), (0, 0), (0, pad)),
                       constant_values=ignore_index)
    n_tiles = P_pad // TP

    target_val = 0.0 if fool == 'source' else 1.0
    kernel = functools.partial(
        _pixadv_kernel,
        ignore_index=ignore_index,
        target_val=target_val,
        exp_dtype=exp_dtype,
    )

    partials = pl.pallas_call(
        kernel,
        out_shape=jax.ShapeDtypeStruct((N, n_tiles, 8, 128), jnp.float32),
        grid=(N, n_tiles),
        in_specs=[
            pl.BlockSpec((1, C, TP), lambda n, t: (n, 0, t)),
            pl.BlockSpec((1, 1, TP), lambda n, t: (n, 0, t)),
            pl.BlockSpec((1, 1, TP), lambda n, t: (n, 0, t)),
            pl.BlockSpec((1, C, 1), lambda n, t: (n, 0, 0)),
        ],
        out_specs=pl.BlockSpec((1, 1, 8, 128), lambda n, t: (n, t, 0, 0)),
        compiler_params=pltpu.CompilerParams(
            dimension_semantics=("parallel", "parallel")),
    )(logits, labs, disc, wpc)

    total = jnp.sum(partials)
    if size_average:
        return total / jnp.float32(N * H * W)
    return total


def ref_pix_adv_loss(parser_prediction, discriminator_pred, labels,
                     fool='source', ignore_index=255):
    """Pure-JAX reference mirroring the PyTorch forward."""
    N, C, H, W = parser_prediction.shape
    x = discriminator_pred.astype(jnp.float32)
    z = 0.0 if fool == 'source' else 1.0
    bce = jnp.maximum(x, 0.0) - x * z + jnp.log1p(jnp.exp(-jnp.abs(x)))
    fooling = bce.reshape(N, H, W)

    logp = jax.nn.log_softmax(parser_prediction.astype(jnp.float32), axis=1)
    safe_labels = jnp.where(labels == ignore_index, 0, labels)
    ce = -jnp.take_along_axis(logp, safe_labels[:, None], axis=1)[:, 0]
    ce = jnp.where(labels == ignore_index, 0.0, ce)

    tot = H * W
    counts = (labels[..., None] == jnp.arange(256)).sum(axis=(1, 2))          # (N, 256)
    pix_counts = jnp.take_along_axis(
        counts, labels.reshape(N, -1), axis=1).reshape(N, H, W)
    weight = 1.0 - pix_counts.astype(jnp.float32) / tot

    loss = fooling * ce * weight
    return loss.mean()


if __name__ == "__main__":
    key = jax.random.PRNGKey(0)
    N, C, H, W = 2, 4, 16, 16
    k1, k2, k3, k4 = jax.random.split(key, 4)

    parser_prediction = jax.random.normal(k1, (N, C, H, W), jnp.float32)
    discriminator_pred = jax.random.normal(k2, (N, 1, H, W), jnp.float32)
    labels = jax.random.randint(k3, (N, H, W), 0, C)
    ignore_mask = jax.random.uniform(k4, (N, H, W)) < 0.1
    labels = jnp.where(ignore_mask, 255, labels).astype(jnp.int32)

    out = pix_adv_loss(parser_prediction, discriminator_pred, labels, fool='source')
    out = jax.block_until_ready(out)

    ref = ref_pix_adv_loss(parser_prediction, discriminator_pred, labels, fool='source')
    assert abs(float(out) - float(ref)) < 1e-4 * max(1.0, abs(float(ref))), (
        f"mismatch: kernel={float(out)} ref={float(ref)}")

    print("KERNEL_OK")
</pallas_src>

<mosaic_0001>
module attributes {stable_mosaic.version = 11 : i64} {
  func.func @_pixadv_kernel(%arg0: i32, %arg1: i32, %arg2: memref<1x4x256xf32, #tpu.memory_space<vmem>>, %arg3: memref<1x1x256xi32, #tpu.memory_space<vmem>>, %arg4: memref<1x1x256xf32, #tpu.memory_space<vmem>>, %arg5: memref<1x4x1xf32, #tpu.memory_space<vmem>>, %arg6: memref<1x1x8x128xf32, #tpu.memory_space<vmem>>) attributes {dimension_semantics = [#tpu.dimension_semantics<parallel>, #tpu.dimension_semantics<parallel>], iteration_bounds = array<i64: 2, 1>, scalar_prefetch = 0 : i64, scratch_operands = 0 : i64, tpu.core_type = #tpu.core_type<tc>, window_params = [{transform_indices = @transform_0, window_bounds = array<i64: 1, 4, 256>}, {transform_indices = @transform_1, window_bounds = array<i64: 1, 1, 256>}, {transform_indices = @transform_2, window_bounds = array<i64: 1, 1, 256>}, {transform_indices = @transform_3, window_bounds = array<i64: 1, 4, 1>}, {transform_indices = @transform_4, window_bounds = array<i64: 1, 1, 8, 128>}]} {
    %c0 = arith.constant 0 : index
    %c0_0 = arith.constant 0 : index
    %c0_1 = arith.constant 0 : index
    %0 = vector.load %arg2[%c0, %c0_0, %c0_1] : memref<1x4x256xf32, #tpu.memory_space<vmem>>, vector<1x4x256xf32>
    %1 = vector.shape_cast %0 : vector<1x4x256xf32> to vector<4x256xf32>
    %c0_2 = arith.constant 0 : index
    %c0_3 = arith.constant 0 : index
    %c0_4 = arith.constant 0 : index
    %2 = vector.load %arg3[%c0_2, %c0_3, %c0_4] : memref<1x1x256xi32, #tpu.memory_space<vmem>>, vector<1x1x256xi32>
    %3 = vector.shape_cast %2 : vector<1x1x256xi32> to vector<1x256xi32>
    %c0_5 = arith.constant 0 : index
    %c0_6 = arith.constant 0 : index
    %c0_7 = arith.constant 0 : index
    %4 = vector.load %arg4[%c0_5, %c0_6, %c0_7] : memref<1x1x256xf32, #tpu.memory_space<vmem>>, vector<1x1x256xf32>
    %5 = vector.shape_cast %4 : vector<1x1x256xf32> to vector<1x256xf32>
    %c0_8 = arith.constant 0 : index
    %c0_9 = arith.constant 0 : index
    %c0_10 = arith.constant 0 : index
    %6 = vector.load %arg5[%c0_8, %c0_9, %c0_10] : memref<1x4x1xf32, #tpu.memory_space<vmem>>, vector<1x4x1xf32>
    %7 = vector.shape_cast %6 : vector<1x4x1xf32> to vector<4x1xf32>
    %cst = arith.constant 0.000000e+00 : f32
    %8 = vector.broadcast %cst : f32 to vector<1x256xf32>
    %9 = arith.maximumf %5, %8 : vector<1x256xf32>
    %cst_11 = arith.constant 0.000000e+00 : f32
    %10 = vector.broadcast %cst_11 : f32 to vector<1x256xf32>
    %11 = arith.mulf %5, %10 : vector<1x256xf32>
    %12 = arith.subf %9, %11 : vector<1x256xf32>
    %13 = math.absf %5 : vector<1x256xf32>
    %cst_12 = arith.constant 0.000000e+00 : f32
    %14 = vector.broadcast %cst_12 : f32 to vector<1x256xf32>
    %15 = arith.subf %14, %13 : vector<1x256xf32>
    %16 = math.exp %15 : vector<1x256xf32>
    %17 = math.log1p %16 : vector<1x256xf32>
    %18 = arith.addf %12, %17 : vector<1x256xf32>
    %cst_13 = arith.constant dense<0xFF800000> : vector<256xf32>
    %19 = vector.multi_reduction <maximumf>, %1, %cst_13 [0] : vector<4x256xf32> to vector<256xf32>
    %20 = vector.shape_cast %19 : vector<256xf32> to vector<1x256xf32>
    %21 = vector.broadcast %20 : vector<1x256xf32> to vector<4x256xf32>
    %22 = arith.subf %1, %21 : vector<4x256xf32>
    %23 = math.exp %22 : vector<4x256xf32>
    %cst_14 = arith.constant dense<0.000000e+00> : vector<256xf32>
    %24 = vector.multi_reduction <add>, %23, %cst_14 [0] : vector<4x256xf32> to vector<256xf32>
    %25 = vector.shape_cast %24 : vector<256xf32> to vector<1x256xf32>
    %26 = math.log %25 : vector<1x256xf32>
    %27 = arith.addf %20, %26 : vector<1x256xf32>
    %28 = tpu.iota {dimensions = array<i32: 0>} : vector<4x256xi32>
    %29 = vector.broadcast %3 : vector<1x256xi32> to vector<4x256xi32>
    %30 = arith.cmpi eq, %28, %29 : vector<4x256xi32>
    %cst_15 = arith.constant 0.000000e+00 : f32
    %31 = vector.broadcast %cst_15 : f32 to vector<4x256xf32>
    %32 = arith.select %30, %1, %31 : vector<4x256xi1>, vector<4x256xf32>
    %cst_16 = arith.constant dense<0.000000e+00> : vector<256xf32>
    %33 = vector.multi_reduction <add>, %32, %cst_16 [0] : vector<4x256xf32> to vector<256xf32>
    %34 = vector.shape_cast %33 : vector<256xf32> to vector<1x256xf32>
    %c255_i32 = arith.constant 255 : i32
    %35 = vector.broadcast %c255_i32 : i32 to vector<1x256xi32>
    %36 = arith.cmpi ne, %3, %35 : vector<1x256xi32>
    %37 = arith.subf %27, %34 : vector<1x256xf32>
    %cst_17 = arith.constant 0.000000e+00 : f32
    %38 = vector.broadcast %cst_17 : f32 to vector<1x256xf32>
    %39 = arith.select %36, %37, %38 : vector<1x256xi1>, vector<1x256xf32>
    %cst_18 = arith.constant 0.000000e+00 : f32
    %40 = vector.shape_cast %7 : vector<4x1xf32> to vector<4x1xf32>
    %41 = vector.broadcast %40 : vector<4x1xf32> to vector<4x256xf32>
    %42 = vector.broadcast %cst_18 : f32 to vector<4x256xf32>
    %43 = arith.select %30, %41, %42 : vector<4x256xi1>, vector<4x256xf32>
    %cst_19 = arith.constant dense<0.000000e+00> : vector<256xf32>
    %44 = vector.multi_reduction <add>, %43, %cst_19 [0] : vector<4x256xf32> to vector<256xf32>
    %45 = vector.shape_cast %44 : vector<256xf32> to vector<1x256xf32>
    %46 = arith.mulf %18, %39 : vector<1x256xf32>
    %47 = arith.mulf %46, %45 : vector<1x256xf32>
    %48 = vector.shape_cast %47 : vector<1x256xf32> to vector<1x1x256xf32>
    %cst_20 = arith.constant dense<0.000000e+00> : vector<1xf32>
    %49 = vector.multi_reduction <add>, %48, %cst_20 [1, 2] : vector<1x1x256xf32> to vector<1xf32>
    %50 = vector.shape_cast %49 : vector<1xf32> to vector<1x1x1xf32>
    %51 = vector.extract %50[0, 0, 0] : f32 from vector<1x1x1xf32>
    %52 = tpu.iota {dimensions = array<i32: 2>} : vector<1x1x8x128xi32>
    %53 = tpu.iota {dimensions = array<i32: 3>} : vector<1x1x8x128xi32>
    %c0_i32 = arith.constant 0 : i32
    %54 = vector.broadcast %c0_i32 : i32 to vector<1x1x8x128xi32>
    %55 = arith.cmpi eq, %52, %54 : vector<1x1x8x128xi32>
    %c0_i32_21 = arith.constant 0 : i32
    %56 = vector.broadcast %c0_i32_21 : i32 to vector<1x1x8x128xi32>
    %57 = arith.cmpi eq, %53, %56 : vector<1x1x8x128xi32>
    %58 = arith.andi %55, %57 : vector<1x1x8x128xi1>
    %cst_22 = arith.constant 0.000000e+00 : f32
    %59 = vector.broadcast %51 : f32 to vector<1x1x8x128xf32>
    %60 = vector.broadcast %cst_22 : f32 to vector<1x1x8x128xf32>
    %61 = arith.select %58, %59, %60 : vector<1x1x8x128xi1>, vector<1x1x8x128xf32>
    %c0_23 = arith.constant 0 : index
    %c0_24 = arith.constant 0 : index
    %c0_25 = arith.constant 0 : index
    %c0_26 = arith.constant 0 : index
    %62 = vector.load %arg6[%c0_23, %c0_24, %c0_25, %c0_26] : memref<1x1x8x128xf32, #tpu.memory_space<vmem>>, vector<1x1x8x128xf32>
    tpu.vector_store %arg6[%c0_23, %c0_24, %c0_25, %c0_26], %61 {strides = array<i32>} : memref<1x1x8x128xf32, #tpu.memory_space<vmem>>, vector<1x1x8x128xf32>,
    return
  }
  func.func @transform_0(%arg0: i32, %arg1: i32) -> (i32, i32, i32) {
    %c0_i32 = arith.constant 0 : i32
    %c0_i32_0 = arith.constant 0 : i32
    return %arg0, %c0_i32, %arg1 : i32, i32, i32
  }
  func.func @transform_1(%arg0: i32, %arg1: i32) -> (i32, i32, i32) {
    %c0_i32 = arith.constant 0 : i32
    %c0_i32_0 = arith.constant 0 : i32
    return %arg0, %c0_i32, %arg1 : i32, i32, i32
  }
  func.func @transform_2(%arg0: i32, %arg1: i32) -> (i32, i32, i32) {
    %c0_i32 = arith.constant 0 : i32
    %c0_i32_0 = arith.constant 0 : i32
    return %arg0, %c0_i32, %arg1 : i32, i32, i32
  }
  func.func @transform_3(%arg0: i32, %arg1: i32) -> (i32, i32, i32) {
    %c0_i32 = arith.constant 0 : i32
    %c0_i32_0 = arith.constant 0 : i32
    %c0_i32_1 = arith.constant 0 : i32
    return %arg0, %c0_i32, %c0_i32_0 : i32, i32, i32
  }
  func.func @transform_4(%arg0: i32, %arg1: i32) -> (i32, i32, i32, i32) {
    %c0_i32 = arith.constant 0 : i32
    %c0_i32_0 = arith.constant 0 : i32
    %c0_i32_1 = arith.constant 0 : i32
    return %arg0, %arg1, %c0_i32, %c0_i32_0 : i32, i32, i32, i32
  }
}

</mosaic_0001>

<bundles_post_ra>
// kernel: tpu_custom_call.1
= control target key start
LH: loop header
LB: loop body
LE: loop exit
PB: predicated region body
PF: predicated region fallthrough
CT: control target
= control target key end

     0   :  { %9 = vsyncpa [#allocation3], 0  ;;  %s1093_s0 = inlined_call_operand.hbm [shape: f32[2,4,256], index: 0, kind: input, shape index: {}]   ;;  %s1094_s1 = inlined_call_operand.vmem [shape: s32[2,1,256], index: 1, kind: input, shape index: {}]   ;;  %s1095_s2 = inlined_call_operand.vmem [shape: f32[2,1,256], index: 2, kind: input, shape index: {}]   ;;  %s1096_s3 = inlined_call_operand.vmem [shape: f32[2,4,1], index: 3, kind: input, shape index: {}]   ;;  %s1097_s4 = inlined_call_operand.hbm [shape: f32[2,1,8,128], index: 4, kind: output, shape index: {}]  }
   0x1   :  { %11 = vsyncpa [#allocation3 + $0x1], 0 }
   0x2   :  { %12 = vsyncpa [#allocation4], 0 }
   0x3   :  { %14 = vsyncpa [#allocation4 + $0x1], 0  ;;  %s882_s15 = smov 0   ;;  %s884_s16 = smov 0  }
   0x4   :  { %s886_s17 = smov 0   ;;  %s888_s18 = smov 0  }
   0x5   :  { %s890_s19 = smov 0   ;;  %s892_s20 = smov 0  }
   0x6 LB: > { %s647_s21 = sadd.s32 4294967295, %s851_s20   ;;  %s648_s22 = sadd.s32 4294967294, %s851_s20   ;;  %s851_s20 = sphi %s892_s20, %s20_s20   ;;  %s847_s19 = sphi %s890_s19, %s1109_s19   ;;  %s843_s18 = sphi %s888_s18, %s1108_s18   ;;  %s839_s17 = sphi %s886_s17, %s1107_s17   ;;  %s835_s16 = sphi %s884_s16, %s1106_s16   ;;  %s831_s15 = sphi %s882_s15, %s1105_s15  }
   0x7   : > { %s32_s23 = sadd.s32 1, %s847_s19  ;;  %s41_s24 = sadd.s32 1, %s839_s17 }
   0x8   : > { %p34_p0 = scmp.ge.s32.totalorder %s32_s23, 2  ;;  %p48_p1 = scmp.ne.s32.totalorder %s839_s17, %s835_s16 }
   0x9   : > { %p49_p2 = scmp.eq.s32.totalorder %s851_s20, 0  ;;  %p54_p3 = scmp.ne.s32.totalorder %s835_s16, %s831_s15 }
   0xa   : > { %s1111_s23 = smov (%p34_p0, %s32_s23), 0  ;;  %p55_p5 = scmp.eq.s32.totalorder %s647_s21, 0 }
   0xb   : > { %p923_p4 = por %p49_p2, %p48_p1  ;;  %s36_s26 = ssub.s32 %s847_s19, %s1111_s23 }
   0xc   : > { %p162_p6 = scmp.eq.s32.totalorder %s647_s21, 1  ;;  %p39_p7 = scmp.eq.s32.totalorder %s36_s26, 0 }
   0xd   : > { %p929_p8 = por %p55_p5, %p54_p3  ;;  %p168_p10 = scmp.eq.s32.totalorder %s648_s22, 1 }
   0xe   : > { %p933_p9 = por %p162_p6, %p48_p1  ;;  %p679_p13 = scmp.lt.s32.totalorder %s851_s20, 2 }
   0xf   : > { %s938_s29 = scalar_select %p39_p7, %s839_s17, %s41_s24  }
  0x10   : > { %p940_p11 = por %p168_p10, %p54_p3  ;;  %s188_s5 = sand.u32 1, %s839_s17  }
  0x11   : > { %s651_s6 = sshll.u32 %s188_s5, 3  ;;  %s664_s7 = sshll.u32 %s847_s19, 7 }
  0x12   : > { %s1101_s30 = scalar_select %p940_p11, 1, 0 }
  0x13   : > { %s200_s10 = scalar_lea.hbm %s1093_s0, %s664_s7  ;;  %s192_s11 = scalar_lea.vmem [#allocation2], %s651_s6 }
  0x14   : > { %s202_s12 = sshll.u32 %s192_s11, 4  ;;  %p953_p0 = pnand %p679_p13, %p923_p4  ;;  %s203_s12 = int_to_ptr.vmem [resolvable:$true] %s202_s12 }
  0x15   : > { %p654_p1 = scmp.ge.s32.totalorder %s851_s20, 1  ;;  %p238_p2 = scmp.lt.s32.totalorder %s851_s20, 3 }
  0x16   : > { %s189_s14 = scalar_lea.sflag [#allocation3], %s188_s5  ;;  %p745_p3 = pneg %p953_p0 }
  0x17   : > { %s756_s21 = scalar_lea.vmem %s203_s12, 128  ;;  %s853_s22 = smov [#allocation2]  }
  0x18   : > { %p757_p5 = scmp.ne.s32.totalorder %s203_s12, %s756_s21  ;;  %s761_s24 = sshll.u32 %s853_s22, 4  ;;  %s762_s24 = int_to_ptr.vmem [resolvable:$false] %s761_s24 }
  0x19   : > { %s763_s26 = scalar_lea.vmem %s762_s24, 256  ;;  %p764_p10 = scmp.lt.s32.totalorder %s203_s12, %s762_s24 }
  0x1a   : > { %p759_p6 = pnand %p757_p5, %p745_p3  ;;  %p765_p12 = scmp.lt.s32.totalorder %s763_s26, %s756_s21 }
  0x1c   : > { %p760_p7 = pneg %p759_p6  ;;  %p766_p4 = por %p765_p12, %p764_p10 }
  0x1e   : > { %p767_p13 = pnand %p766_p4, %p760_p7 }
  0x20   : > { %770 = shalt.err (!%p767_p13)
}
  0x21   : > { %674 = dma.hbm_to_vmem [thread:$0]  (!%p953_p0), %s200_s10, 128, %s203_s12, %s189_s14  }
  0x22   : > { %p239_p11 = pnand %p654_p1, %p238_p2 }
  0x23   : > { %s968_s25 = sand.u32 (!%p239_p11), 1, %s835_s16  }
  0x24   : > { %242 = sbr.rel (%p239_p11) target bundleno = 415 (0x19f), region = 36  ;;  %s655_s5 = sshll.u32 (!%p239_p11), %s968_s25, 3 }
  0x25   : > { %s245_s6 = scalar_lea.sflag (!%p239_p11), [#allocation3], %s968_s25  ;;  %s248_s7 = scalar_lea.vmem (!%p239_p11), [#allocation2], %s655_s5 }
  0x29   : > { %822 = dma.done.wait (%p929_p8), %s245_s6, 128  }
  0x2a   : > { %824 = vsyncadd (%p929_p8), %s245_s6, 4294967168  ;;  %p295_p12 = scmp.lt.s32.totalorder %s843_s18, 1  ;;  %v854_v0 = vmov 0   ;;  %v316_v2 = vld [vmem:[%s248_s7] sm:$0xff]  ;;  %vm340_vm0 = vcmask 1043456   ;;  %v385_v25 = vlaneseq  ;;  %vm487_vm5 = vcmask 1040384  }
  0x2b   : > { %731 = vset.pattern.permute.xlu0 %v854_v0  ;;  %v338_v3 = vcombine.high %v316_v2, %v316_v2  ;;  %v341_v4 = vsel %vm340_vm0, %v316_v2, -inf  ;;  %s661_s6 = sshll.u32 %s843_s18, 7  ;;  %s292_s7 = scalar_lea.vmem [#allocation5], %s655_s5 }
  0x2c   : > { %s980_s8 = scalar_select %p295_p12, %s843_s18, 1  ;;  %v342_v6 = vrot.slane %v341_v4, 4  ;;  %v1001_v28 = vshrl.u32 %v385_v25, 7 }
  0x2d   : > { %v348_v5 = vsel %vm340_vm0, %v338_v3, -inf  ;;  %s856_s18 = smov [#allocation5]  }
  0x2e   : > { %s659_s9 = sshll.u32 %s980_s8, 2  ;;  %v349_v7 = vrot.slane %v348_v5, 4  ;;  %v343_v8 = vmax.f32 %v341_v4, %v342_v6  ;;  %s657_s27 = sshll.u32 %s980_s8, 1  ;;  %v389_v32 = vsub.s32 0, %v1001_v28  ;;  %v393_v33 = vsub.s32 1, %v1001_v28 }
  0x2f   : > { %s315_s12 = scalar_lea.vmem %s1096_s3, %s659_s9  ;;  %s310_s21 = scalar_lea.vmem %s1095_s2, %s657_s27  ;;  %v855_v4 = vmov 1966171168   ;;  %vm502_vm6 = vcmp.eq.s32.totalorder %v1001_v28, 0 }
  0x30   : > { %v319_v1 = vld [vmem:[%s315_s12] sm:$0xf]  ;;  %v350_v9 = vmax.f32 %v348_v5, %v349_v7  ;;  %v344_v10 = vrot.slane %v343_v8, 2  ;;  %s301_s26 = scalar_lea.vmem %s1094_s1, %s657_s27  ;;  %v420_v5 = vunpack.c.l.s4 %v855_v4  ;;  %s523_s8 = sshll.u32 %s292_s7, 4  ;;  %s524_s8 = int_to_ptr.vmem [resolvable:$true] %s523_s8 }
  0x31   : > { %437 = vperm.xlu0 %731, %v319_v1   ;;  %v1006_v31 = vld [vmem:[%s310_s21] sm:$0x3]  ;;  %s1051_s12 = scalar_lea.hbm %s1097_s4, %s661_s6  ;;  %s509_s27 = scalar_lea.sflag [#allocation4], %s968_s25 }
  0x32   : > { %v351_v11 = vrot.slane %v350_v9, 2  ;;  %v345_v12 = vmax.f32 %v343_v8, %v344_v10  ;;  %v1010_v34 = vld [vmem:[%s301_s26] sm:$0x3]  ;;  %v323_v36 = vand.u32 2147483647, %v1006_v31  ;;  %v421_v10 = vunpack.c.0.s8 %v420_v5  ;;  %s771_s13 = scalar_lea.vmem %s524_s8, 128 }
  0x33   : > { %v390_v38 = vrot.slane %v1010_v34, %v389_v32  ;;  %v394_v40 = vrot.slane %v1010_v34, %v393_v33  ;;  %vm413_vm4 = vcmp.ne.s32.totalorder %v1010_v34, 255  ;;  %p772_p8 = scmp.ne.s32.totalorder %s524_s8, %s771_s13  ;;  %s775_s5 = sshll.u32 %s856_s18, 4  ;;  %s776_s5 = int_to_ptr.vmem [resolvable:$false] %s775_s5 }
  0x34   : > { %v352_v13 = vmax.f32 %v350_v9, %v351_v11  ;;  %v346_v14 = vrot.slane %v345_v12, 1  ;;  %v324_v41 = vsub.f32 0.0, %v323_v36  ;;  %s777_s14 = scalar_lea.vmem %s776_s5, 256  ;;  %p778_p1 = scmp.lt.s32.totalorder %s524_s8, %s776_s5 }
  0x35   : > { %vm395_vm1 = vcmp.eq.s32.totalorder %v1001_v28, %v390_v38  ;;  %vm396_vm2 = vcmp.eq.s32.totalorder %v1001_v28, %v394_v40  ;;  %p773_p11 = pnand %p772_p8, %p933_p9  ;;  %p779_p2 = scmp.lt.s32.totalorder %s777_s14, %s771_s13 }
  0x36   : > { %v353_v15 = vrot.slane %v352_v13, 1  ;;  %v988_v16 = vmax.f32 %v345_v12, %v346_v14  ;;  %v325_v44 = vmul.f32 1.442695, %v324_v41  ;;  %v397_v46 = vsel %vm395_vm1, %v316_v2, 0.0 }
  0x37   : > { %v398_v47 = vsel %vm396_vm2, %v338_v3, 0.0  ;;  %v399_v50 = vsel %vm340_vm0, %v397_v46, 0.0  ;;  %p774_p0 = pneg %p773_p11  ;;  %p780_p3 = por %p779_p2, %p778_p1 }
  0x38   : > { %v990_v17 = vmax.f32 %v352_v13, %v353_v15  ;;  %v406_v51 = vsel %vm340_vm0, %v398_v47, 0.0  ;;  %v400_v52 = vrot.slane %v399_v50, 4 }
  0x39   : > { %v407_v53 = vrot.slane %v406_v51, 4  ;;  %p781_p5 = pnand %p780_p3, %p774_p0 }
  0x3a   : > { %v357_v18 = vcombine.low %v988_v16, %v990_v17  ;;  %v401_v54 = vadd.f32 %v400_v52, %v399_v50 }
  0x3b   : > { %v408_v55 = vadd.f32 %v407_v53, %v406_v51 }
  0x3c   : > { %v359_v19 = vsub.f32 %v316_v2, %v357_v18  ;;  %v402_v56 = vrot.slane %v401_v54, 2 }
  0x3d   : > { %v409_v57 = vrot.slane %v408_v55, 2 }
  0x3e   : > { %v360_v20 = vmul.f32 1.442695, %v359_v19  ;;  %v403_v59 = vadd.f32 %v402_v56, %v401_v54  ;;  %v424_v19 = vsub.s32 %v421_v10, %v1001_v28 }
  0x3f   : > { %v410_v61 = vadd.f32 %v409_v57, %v408_v55 }
  0x40   : > { %733 = vpow2.f32 %v360_v20  ;;  %v404_v0 = vrot.slane %v403_v59, 1 }
  0x41   : > { %735 = vpow2.f32 %v325_v44  ;;  %v411_v3 = vrot.slane %v410_v61, 1 }
  0x42   : > { %v405_v8 = vadd.f32 %v404_v0, %v403_v59 }
  0x43   : > { %v412_v9 = vadd.f32 %v411_v3, %v410_v61 }
  0x4d   : > { %v734_v21 = vpop.eup %733 }
  0x4e   : > { %v363_v22 = vcombine.high %v734_v21, %v734_v21  ;;  %v365_v23 = vsel %vm340_vm0, %v734_v21, 0.0  ;;  %v736_v58 = vpop.eup %735 }
  0x4f   : > { %v366_v26 = vrot.slane %v365_v23, 4  ;;  %v327_v62 = vadd.f32 1.0, %v736_v58  ;;  %v330_v13 = vmul.f32 -0.5, %v736_v58 }
  0x50   : > { %v372_v24 = vsel %vm340_vm0, %v363_v22, 0.0 }
  0x51   : > { %v373_v27 = vrot.slane %v372_v24, 4  ;;  %v367_v29 = vadd.f32 %v366_v26, %v365_v23  ;;  %v331_v21 = vadd.f32 1.0, %v330_v13  ;;  %v333_v26 = vand.u32 2147483647, %v736_v58 }
  0x53   : > { %v374_v30 = vadd.f32 %v373_v27, %v372_v24  ;;  %v368_v35 = vrot.slane %v367_v29, 2  ;;  %v320_v27 = vmax.f32 %v1006_v31, 0.0  ;;  %vm334_vm3 = vcmp.lt.f32.partialorder %v333_v26, 0.0004427343 }
  0x55   : > { %v375_v37 = vrot.slane %v374_v30, 2  ;;  %v369_v39 = vadd.f32 %v368_v35, %v367_v29  ;;  %v321_v29 = vmul.f32 0.0, %v1006_v31 }
  0x57   : > { %v376_v42 = vadd.f32 %v375_v37, %v374_v30  ;;  %v370_v43 = vrot.slane %v369_v39, 1  ;;  %v332_v37 = vmul.f32 %v736_v58, %v331_v21  ;;  %v322_v41 = vsub.f32 %v320_v27, %v321_v29 }
  0x59   : > { %v377_v45 = vrot.slane %v376_v42, 1  ;;  %v371_v48 = vadd.f32 %v370_v43, %v369_v39 }
  0x5b   : > { %v378_v49 = vadd.f32 %v377_v45, %v376_v42  ;;  %737 = vlog2.f32 %v371_v48 }
  0x5d   : > { %739 = vlog2.f32 %v378_v49 }
  0x5e   : > { %741 = vlog2.f32 %v327_v62 }
  0x68   : > { %v738_v60 = vpop.eup %737 }
  0x69   : > { %v380_v1 = vmul.f32 0.6931472, %v738_v60 }
  0x6a   : > { %v740_v63 = vpop.eup %739 }
  0x6b   : > { %v382_v2 = vmul.f32 0.6931472, %v740_v63  ;;  %v383_v6 = vadd.f32 %v380_v1, %v988_v16  ;;  %v742_v22 = vpop.eup %741 }
  0x6c   : > { %v329_v36 = vmul.f32 0.6931472, %v742_v22 }
  0x6d   : > { %v384_v7 = vadd.f32 %v382_v2, %v990_v17  ;;  %v414_v11 = vsub.f32 %v383_v6, %v405_v8 }
  0x6e   : > { %v335_v44 = vsel %vm334_vm3, %v332_v37, %v329_v36 }
  0x6f   : > { %v415_v12 = vsub.f32 %v384_v7, %v412_v9  ;;  %v336_v31 = vadd.f32 %v335_v44, %v322_v41 }
  0x71   : > { %v418_v20 = vcombine.low %v414_v11, %v415_v12 }
  0x73   : > { %v425_v38 = vrot.slane %v418_v20, %v424_v19 }
  0x75   : > { %v432_v45 = vrot.slane %v425_v38, %v424_v19 }
  0x77   : > { %v434_v50 = vsel %vm413_vm4, %v432_v45, 0.0 }
  0x78   : > { %v456_v52 = vmul.f32 %v434_v50, %v336_v31 }
  0xac   : > { %v438_v14 = vpop.permute.xlu0 %437 }
  0xad   : > { %v440_v15 = vsel %vm395_vm1, %v438_v14, 0.0  ;;  %v441_v18 = vsel %vm396_vm2, %v438_v14, 0.0 }
  0xae   : > { %v442_v16 = vsel %vm340_vm0, %v440_v15, 0.0  ;;  %v449_v17 = vsel %vm340_vm0, %v441_v18, 0.0 }
  0xaf   : > { %v443_v23 = vrot.slane %v442_v16, 4  ;;  %v450_v24 = vrot.slane %v449_v17, 4 }
  0xb1   : > { %v444_v30 = vadd.f32 %v443_v23, %v442_v16  ;;  %v451_v35 = vadd.f32 %v450_v24, %v449_v17 }
  0xb3   : > { %v445_v39 = vrot.slane %v444_v30, 2  ;;  %v452_v40 = vrot.slane %v451_v35, 2 }
  0xb5   : > { %v446_v42 = vadd.f32 %v445_v39, %v444_v30  ;;  %v453_v43 = vadd.f32 %v452_v40, %v451_v35 }
  0xb7   : > { %v447_v46 = vrot.slane %v446_v42, 1  ;;  %v454_v47 = vrot.slane %v453_v43, 1 }
  0xb9   : > { %v448_v48 = vadd.f32 %v447_v46, %v446_v42  ;;  %v455_v49 = vadd.f32 %v454_v47, %v453_v43 }
  0xbb   : > { %v459_v51 = vcombine.low %v448_v48, %v455_v49 }
  0xbd   : > { %v466_v53 = vrot.slane %v459_v51, %v424_v19 }
  0xbf   : > { %v473_v54 = vrot.slane %v466_v53, %v424_v19 }
  0xc1   : > { %v475_v55 = vmul.f32 %v473_v54, %v456_v52 }
  0xc3   : > { %v480_v56 = vrot.slane %v475_v55, %v389_v32  ;;  %v484_v57 = vrot.slane %v475_v55, %v393_v33  ;;  %v501_v32 = vand.u32 127, %v385_v25 }
  0xc5   : > { %v488_v34 = vsel %vm487_vm5, %v480_v56, 0.0  ;;  %v489_v58 = vsel %vm487_vm5, %v484_v57, 0.0  ;;  %vm503_vm7 = vcmp.eq.s32.totalorder %v501_v32, 0 }
  0xc6   : > { %v490_v59 = vadd.f32 %v489_v58, %v488_v34  ;;  %vm504_vm8 = vmand %vm502_vm6, %vm503_vm7 }
  0xc8   : > { %491 = vadd.xlane.f32.xlu0 %v490_v59 }
 0x151   : > { %v492_v60 = vpop.xlane.xlu0 %491 }
 0x152   : > { %v493_v61 = vrot.slane %v492_v60, 4 }
 0x154   : > { %v494_v62 = vadd.f32 %v493_v61, %v492_v60 }
 0x156   : > { %v495_v63 = vrot.slane %v494_v62, 2 }
 0x158   : > { %v496_v0 = vadd.f32 %v495_v63, %v494_v62 }
 0x15a   : > { %v497_v1 = vrot.slane %v496_v0, 1 }
 0x15c   : > { %v498_v2 = vadd.f32 %v497_v1, %v496_v0 }
 0x15e   : > { %665 = vpush %v498_v2 }
 0x18f   : > { %s666_s9 = spop %665 }
 0x190   : > { %v505_v33 = vstv %s666_s9 }
 0x191   : > { %v506_v3 = vsel %vm504_vm8, %v505_v33, 0.0 }
 0x192   : > { %507 = vst [vmem:[%s292_s7] sm:$0xff] %v506_v3 }
 0x193   : > { %784 = shalt.err (!%p781_p5)
}
 0x194   : > { %s785_s21 = scalar_lea.hbm %s1051_s12, 128  ;;  %s789_s24 = scalar_lea.hbm %s1097_s4, 256 }
 0x195   : > { %p786_p6 = scmp.ne.s32.totalorder %s1051_s12, %s785_s21  ;;  %p790_p4 = scmp.lt.s32.totalorder %s1051_s12, %s1097_s4 }
 0x196   : > { %p791_p13 = scmp.lt.s32.totalorder %s789_s24, %s785_s21 }
 0x197   : > { %p787_p7 = pnand %p786_p6, %p933_p9 }
 0x198   : > { %p792_p12 = por %p791_p13, %p790_p4 }
 0x199   : > { %p788_p10 = pneg %p787_p7 }
 0x19b   : > { %p793_p8 = pnand %p792_p12, %p788_p10 }
 0x19d   : > { %796 = shalt.err (!%p793_p8)
}
 0x19e   : > { %669 = dma.vmem_to_hbm [thread:$0]  (%p933_p9), %s524_s8, 128, %s1051_s12, %s509_s27  }
 0x19f PF: > { %s535_s7 = sand.u32 1, %s831_s15   ;;  %p1103_p11 = scmp.ne.s32.totalorder %s1101_s30, 0 }
 0x1a0   : > { %p1104_p0 = scmp.ge.s32.totalorder %s851_s20, 2  ;;  %s536_s9 = scalar_lea.sflag [#allocation4], %s535_s7 }
 0x1a2   : > { %p676_p1 = pnand %p1104_p0, %p1103_p11 }
 0x1a4   : > { %p677_p2 = pneg %p676_p1 }
 0x1a6   : > { %826 = dma.done.wait (%p677_p2), %s536_s9, 128  }
 0x1a7   : > { %828 = vsyncadd (%p677_p2), %s536_s9, 4294967168  ;;  %s20_s20 = sadd.s32 1, %s851_s20   ;;  %s1105_s15 = smov %s835_s16 }
 0x1a8   : > { %p17_p3 = scmp.ge.s32.totalorder %s20_s20, 4   ;;  %s1106_s16 = smov %s839_s17 }
 0x1a9   : > { %s1107_s17 = smov %s938_s29  ;;  %s1108_s18 = smov %s847_s19 }
 0x1aa   : > { %s1109_s19 = smov %s1111_s23  ;;  %19 = sbr.rel (!%p17_p3) target bundleno = 6 (0x6), region = 90 }
 0x1af   :  { %541 = vsyncpa [#allocation3], 1 }
 0x1b0   :  { %543 = vsyncpa [#allocation3 + $0x1], 1 }
 0x1b1   :  { %544 = vsyncpa [#allocation4], 1 }
 0x1b2   :  { %546 = vsyncpa [#allocation4 + $0x1], 1 }

</bundles_post_ra>
